<compile_context>
chip_gen: v7x
topology: tpu7x:2x2x1
jax: 0.10.0
libtpu: 0.0.40
codegen_flags: <defaults>
</compile_context>

<pallas_src>
import jax
import jax.numpy as jnp
from jax.experimental import pallas as pl
from jax.experimental.pallas import tpu as pltpu


def _round_up(n, m):
    return ((n + m - 1) // m) * m


def _discriminator_kernel(inp_ref, w1_ref, b1_ref, w2_ref, b2_ref, out_ref):
    # inp_ref : (TILE_B, d_in)   bf16  VMEM  (concatenated [theta, x] tile)
    # w1_ref  : (d_in, 128)      bf16  VMEM  (resident across the grid)
    # b1_ref  : (1, 128)         f32   VMEM
    # w2_ref  : (1, 128)         f32   VMEM  (second-layer weight as a row)
    # b2_ref  : (1, 1)           f32   SMEM  (scalar)
    # out_ref : (TILE_B, 1)      f32   VMEM

    # Single K=d_in MXU matmul, bf16 operands, f32 accumulation.
    h = jnp.dot(inp_ref[...], w1_ref[...], preferred_element_type=jnp.float32)
    h = jnp.maximum(h + b1_ref[...], 0.0)                      # bias + ReLU (VPU, f32)

    # Linear(128, 1): VPU multiply + lane (XLU) reduction instead of an MXU
    # matmul that would use 1/256 of the output lanes.
    y = jnp.sum(h * w2_ref[...], axis=-1, keepdims=True) + b2_ref[0, 0]

    # Exact sigmoid: EUP exp + exact divide (bit-faithful to the module).
    out_ref[...] = 1.0 / (1.0 + jnp.exp(-y))


def discriminator_forward(theta, x, params, tile_b=8192):
    """theta: (B, theta_dim) f32, x: (B, x_dim) f32 -> (B, 1) f32."""
    w1, b1, w2, b2 = params
    B, theta_dim = theta.shape
    x_dim = x.shape[1]
    d_in = theta_dim + x_dim
    hidden = w1.shape[1]

    # Concat once in the wrapper (tiny XLA op): one dense (B, d_in) input lets
    # the kernel run a single K=d_in matmul and a single per-tile input DMA.
    inp = jnp.concatenate([theta, x], axis=1).astype(jnp.float32)

    # Batch tile: adaptive, multiple of 8 sublanes (default 8192 is also a
    # multiple of the bf16 sublane tile of 16).  Pad B to a tile multiple.
    tile_b = min(tile_b, _round_up(B, 8))
    Bp = _round_up(B, tile_b)
    if Bp != B:
        inp = jnp.pad(inp, ((0, Bp - B), (0, 0)))

    # One-time weight plumbing (tiny).  MXU operands in bf16; the rest f32.
    inp_bf = inp.astype(jnp.bfloat16)
    w1_bf = w1.astype(jnp.bfloat16)
    b1_row = b1.reshape(1, hidden).astype(jnp.float32)
    w2_row = w2.reshape(1, hidden).astype(jnp.float32)
    b2_s = b2.reshape(1, 1).astype(jnp.float32)

    grid = (Bp // tile_b,)
    cost = pl.CostEstimate(
        flops=2 * Bp * d_in * hidden + 2 * Bp * hidden,
        transcendentals=2 * Bp,                      # exp + divide per row
        bytes_accessed=(2 * Bp * d_in                # bf16 input
                        + 2 * d_in * hidden          # bf16 w1
                        + 4 * (2 * hidden + 1)       # f32 b1, w2, b2
                        + 4 * Bp),                   # f32 output
    )

    out = pl.pallas_call(
        _discriminator_kernel,
        out_shape=jax.ShapeDtypeStruct((Bp, 1), jnp.float32),
        grid=grid,
        in_specs=[
            pl.BlockSpec((tile_b, d_in), lambda i: (i, 0)),
            pl.BlockSpec((d_in, hidden), lambda i: (0, 0)),
            pl.BlockSpec((1, hidden), lambda i: (0, 0)),
            pl.BlockSpec((1, hidden), lambda i: (0, 0)),
            pl.BlockSpec(memory_space=pltpu.MemorySpace.SMEM),
        ],
        out_specs=pl.BlockSpec((tile_b, 1), lambda i: (i, 0)),
        compiler_params=pltpu.CompilerParams(
            dimension_semantics=("parallel",),       # independent batch tiles
            vmem_limit_bytes=48 * 1024 * 1024,       # explicit budget (fits v7x 64 MiB)
        ),
        cost_estimate=cost,
    )(inp_bf, w1_bf, b1_row, w2_row, b2_s)

    return out[:B]


def init_params(key, theta_dim, x_dim, hidden=128):
    """Deterministic synthetic init (same shapes as the PyTorch module)."""
    d_in = theta_dim + x_dim
    k1, k2, k3, k4 = jax.random.split(key, 4)
    bound1 = 1.0 / jnp.sqrt(d_in)
    bound2 = 1.0 / jnp.sqrt(hidden)
    w1 = jax.random.uniform(k1, (d_in, hidden), jnp.float32, -bound1, bound1)
    b1 = jax.random.uniform(k2, (hidden,), jnp.float32, -bound1, bound1)
    w2 = jax.random.uniform(k3, (hidden, 1), jnp.float32, -bound2, bound2)
    b2 = jax.random.uniform(k4, (1,), jnp.float32, -bound2, bound2)
    return w1, b1, w2, b2


if __name__ == "__main__":
    key = jax.random.PRNGKey(0)
    k_theta, k_x, k_params = jax.random.split(key, 3)

    B, theta_dim, x_dim = 8, 4, 12
    theta = jax.random.normal(k_theta, (B, theta_dim), jnp.float32)
    x = jax.random.normal(k_x, (B, x_dim), jnp.float32)
    params = init_params(k_params, theta_dim, x_dim)

    out = discriminator_forward(theta, x, params)
    out = jax.block_until_ready(out)

    # Reference check in plain JAX (full f32, exact sigmoid).
    w1, b1, w2, b2 = params
    inp = jnp.concatenate([theta, x], axis=1)
    ref = jax.nn.sigmoid(jnp.maximum(inp @ w1 + b1, 0.0) @ w2 + b2)
    assert out.shape == (B, 1)
    # Kernel uses bf16 MXU operands with f32 accumulation -> small deviation
    # from the f32 reference (estimated < 1e-3 on sigmoid outputs).
    assert jnp.allclose(out, ref, atol=5e-3), "mismatch vs reference"

    print("KERNEL_OK")
</pallas_src>

<mosaic_0001>
module attributes {stable_mosaic.version = 11 : i64} {
  func.func @_discriminator_kernel(%arg0: i32, %arg1: memref<8x16xbf16, #tpu.memory_space<vmem>>, %arg2: memref<16x128xbf16, #tpu.memory_space<vmem>>, %arg3: memref<1x128xf32, #tpu.memory_space<vmem>>, %arg4: memref<1x128xf32, #tpu.memory_space<vmem>>, %arg5: memref<1x1xf32, #tpu.memory_space<smem>>, %arg6: memref<8x1xf32, #tpu.memory_space<vmem>>) attributes {dimension_semantics = [#tpu.dimension_semantics<parallel>], iteration_bounds = array<i64: 1>, scalar_prefetch = 0 : i64, scratch_operands = 0 : i64, tpu.core_type = #tpu.core_type<tc>, window_params = [{transform_indices = @transform_0, window_bounds = array<i64: 8, 16>}, {pipeline_mode = #tpu.pipeline_mode<synchronous>, transform_indices = @transform_1, window_bounds = array<i64: 16, 128>}, {pipeline_mode = #tpu.pipeline_mode<synchronous>, transform_indices = @transform_2, window_bounds = array<i64: 1, 128>}, {pipeline_mode = #tpu.pipeline_mode<synchronous>, transform_indices = @transform_3, window_bounds = array<i64: 1, 128>}, {transform_indices = @transform_4, window_bounds = array<i64: 1, 1>}, {transform_indices = @transform_5, window_bounds = array<i64: 8, 1>}]} {
    %c0 = arith.constant 0 : index
    %c0_0 = arith.constant 0 : index
    %0 = vector.load %arg1[%c0, %c0_0] : memref<8x16xbf16, #tpu.memory_space<vmem>>, vector<8x16xbf16>
    %c0_1 = arith.constant 0 : index
    %c0_2 = arith.constant 0 : index
    %1 = vector.load %arg2[%c0_1, %c0_2] : memref<16x128xbf16, #tpu.memory_space<vmem>>, vector<16x128xbf16>
    %cst = arith.constant dense<0.000000e+00> : vector<8x128xf32>
    %2 = tpu.matmul %0, %1, %cst {dimension_numbers = #tpu.dot_dimension_numbers<[1], [0], [0], [1], [0, 0, 1, 1], [], []>} : vector<8x16xbf16>, vector<16x128xbf16>, vector<8x128xf32> -> vector<8x128xf32>
    %c0_3 = arith.constant 0 : index
    %c0_4 = arith.constant 0 : index
    %3 = vector.load %arg3[%c0_3, %c0_4] : memref<1x128xf32, #tpu.memory_space<vmem>>, vector<1x128xf32>
    %4 = vector.broadcast %3 : vector<1x128xf32> to vector<8x128xf32>
    %5 = arith.addf %2, %4 : vector<8x128xf32>
    %cst_5 = arith.constant 0.000000e+00 : f32
    %6 = vector.broadcast %cst_5 : f32 to vector<8x128xf32>
    %7 = arith.maximumf %5, %6 : vector<8x128xf32>
    %c0_6 = arith.constant 0 : index
    %c0_7 = arith.constant 0 : index
    %8 = vector.load %arg4[%c0_6, %c0_7] : memref<1x128xf32, #tpu.memory_space<vmem>>, vector<1x128xf32>
    %9 = vector.broadcast %8 : vector<1x128xf32> to vector<8x128xf32>
    %10 = arith.mulf %7, %9 : vector<8x128xf32>
    %cst_8 = arith.constant dense<0.000000e+00> : vector<8xf32>
    %11 = vector.multi_reduction <add>, %10, %cst_8 [1] : vector<8x128xf32> to vector<8xf32>
    %12 = vector.shape_cast %11 : vector<8xf32> to vector<8x1xf32>
    %c0_9 = arith.constant 0 : index
    %c0_10 = arith.constant 0 : index
    %13 = memref.load %arg5[%c0_9, %c0_10] : memref<1x1xf32, #tpu.memory_space<smem>>
    %14 = vector.broadcast %13 : f32 to vector<8x1xf32>
    %15 = arith.addf %12, %14 : vector<8x1xf32>
    %cst_11 = arith.constant 0.000000e+00 : f32
    %16 = vector.broadcast %cst_11 : f32 to vector<8x1xf32>
    %17 = arith.subf %16, %15 : vector<8x1xf32>
    %18 = math.exp %17 : vector<8x1xf32>
    %cst_12 = arith.constant 1.000000e+00 : f32
    %19 = vector.broadcast %cst_12 : f32 to vector<8x1xf32>
    %20 = arith.addf %19, %18 : vector<8x1xf32>
    %cst_13 = arith.constant 1.000000e+00 : f32
    %21 = vector.broadcast %cst_13 : f32 to vector<8x1xf32>
    %22 = arith.divf %21, %20 : vector<8x1xf32>
    %c0_14 = arith.constant 0 : index
    %c0_15 = arith.constant 0 : index
    %23 = vector.load %arg6[%c0_14, %c0_15] : memref<8x1xf32, #tpu.memory_space<vmem>>, vector<8x1xf32>
    tpu.vector_store %arg6[%c0_14, %c0_15], %22 {strides = array<i32>} : memref<8x1xf32, #tpu.memory_space<vmem>>, vector<8x1xf32>,
    return
  }
  func.func @transform_0(%arg0: i32) -> (i32, i32) {
    %c0_i32 = arith.constant 0 : i32
    %c0_i32_0 = arith.constant 0 : i32
    return %arg0, %c0_i32 : i32, i32
  }
  func.func @transform_1(%arg0: i32) -> (i32, i32) {
    %c0_i32 = arith.constant 0 : i32
    %c0_i32_0 = arith.constant 0 : i32
    %c0_i32_1 = arith.constant 0 : i32
    return %c0_i32, %c0_i32_0 : i32, i32
  }
  func.func @transform_2(%arg0: i32) -> (i32, i32) {
    %c0_i32 = arith.constant 0 : i32
    %c0_i32_0 = arith.constant 0 : i32
    %c0_i32_1 = arith.constant 0 : i32
    return %c0_i32, %c0_i32_0 : i32, i32
  }
  func.func @transform_3(%arg0: i32) -> (i32, i32) {
    %c0_i32 = arith.constant 0 : i32
    %c0_i32_0 = arith.constant 0 : i32
    %c0_i32_1 = arith.constant 0 : i32
    return %c0_i32, %c0_i32_0 : i32, i32
  }
  func.func @transform_4(%arg0: i32) -> (i32, i32) {
    %c0_i32 = arith.constant 0 : i32
    %c0_i32_0 = arith.constant 0 : i32
    %c0_i32_1 = arith.constant 0 : i32
    return %c0_i32, %c0_i32_0 : i32, i32
  }
  func.func @transform_5(%arg0: i32) -> (i32, i32) {
    %c0_i32 = arith.constant 0 : i32
    %c0_i32_0 = arith.constant 0 : i32
    return %arg0, %c0_i32 : i32, i32
  }
}

</mosaic_0001>

<bundles_post_ra>
// kernel: tpu_custom_call.1
= control target key start
LH: loop header
LB: loop body
LE: loop exit
PB: predicated region body
PF: predicated region fallthrough
CT: control target
= control target key end

     0   :  { %11 = vsyncpa [#allocation4], 0  ;;  %s286_s0 = inlined_call_operand.hbm [shape: bf16[8,16], index: 0, kind: input, shape index: {}]   ;;  %s287_s1 = inlined_call_operand.hbm [shape: bf16[16,128], index: 1, kind: input, shape index: {}]   ;;  %s288_s2 = inlined_call_operand.vmem [shape: f32[1,128], index: 2, kind: input, shape index: {}]   ;;  %s289_s3 = inlined_call_operand.vmem [shape: f32[1,128], index: 3, kind: input, shape index: {}]   ;;  %s290_s4 = inlined_call_operand.<no memory space> [shape: f32[1,1], index: 4, kind: input, shape index: {}]   ;;  %s291_s5 = inlined_call_operand.vmem [shape: f32[8,1], index: 5, kind: output, shape index: {}]  }
   0x1   :  { %12 = vsyncpa [#allocation6], 0  ;;  %s207_s18 = smov [#allocation3]   ;;  %s208_s20 = smov [#allocation5]  }
   0x2   :  { %s19_s19 = sshll.u32 %s207_s18, 4  ;;  %s28_s21 = sshll.u32 %s208_s20, 4  ;;  %s20_s19 = int_to_ptr.vmem [resolvable:$true] %s19_s19  ;;  %s243_s21 = int_to_ptr.vmem [resolvable:$true] %s28_s21 }
   0x3   :  { %s159_s24 = scalar_lea.hbm %s286_s0, 64 }
   0x4   :  { %p160_p0 = scmp.ne.s32.totalorder %s286_s0, %s159_s24  ;;  %p163_p1 = scmp.lt.u32.totalorder %s159_s24, %s286_s0 }
   0x6   :  { %p165_p2 = pnand %p163_p1, %p160_p0 }
   0x8   :  { %168 = shalt.err (!%p165_p2)
}
   0x9   :  { %s169_s29 = scalar_lea.vmem %s20_s19, 64  ;;  %p174_p4 = scmp.lt.s32.totalorder %s20_s19, %s20_s19 }
   0xa   :  { %p170_p3 = scmp.ne.s32.totalorder %s20_s19, %s169_s29  ;;  %p175_p5 = scmp.lt.s32.totalorder %s169_s29, %s169_s29 }
   0xc   :  { %p176_p6 = por %p175_p5, %p174_p4 }
   0xe   :  { %p177_p7 = pnand %p176_p6, %p170_p3 }
  0x10   :  { %180 = shalt.err (!%p177_p7)
}
  0x11   :  { %22 = dma.hbm_to_vmem [thread:$0]  %s286_s0, 64, %s20_s19, [#allocation4]  }
  0x12   :  { %s181_s9 = scalar_lea.hbm %s287_s1, 128 }
  0x13   :  { %p182_p8 = scmp.ne.s32.totalorder %s287_s1, %s181_s9  ;;  %p185_p9 = scmp.lt.u32.totalorder %s181_s9, %s287_s1 }
  0x15   :  { %p187_p10 = pnand %p185_p9, %p182_p8 }
  0x17   :  { %190 = shalt.err (!%p187_p10)
}
  0x18   :  { %s191_s14 = scalar_lea.vmem %s243_s21, 128  ;;  %p196_p12 = scmp.lt.s32.totalorder %s243_s21, %s243_s21 }
  0x19   :  { %p192_p11 = scmp.ne.s32.totalorder %s243_s21, %s191_s14  ;;  %p197_p13 = scmp.lt.s32.totalorder %s191_s14, %s191_s14 }
  0x1b   :  { %p198_p0 = por %p197_p13, %p196_p12 }
  0x1d   :  { %p199_p1 = pnand %p198_p0, %p192_p11 }
  0x1f   :  { %202 = shalt.err (!%p199_p1)
}
  0x20   :  { %s209_s0 = smov 64   ;;  %s210_s15 = smov 4  }
  0x21   :  { %34 = dma.hbm_to_vmem [thread:$0]  %s287_s1, 128, %s243_s21, [#allocation6], %s209_s0, %s209_s0, %s210_s15  }
  0x22   :  { %203 = dma.done.wait [#allocation4], 64  }
  0x23   :  { %204 = vsyncadd [#allocation4], 4294967232 }
  0x24   :  { %205 = dma.done.wait [#allocation6], 128  }
  0x25   :  { %206 = vsyncadd [#allocation6], 4294967168  ;;  %v211_v0 = vmov 0.0   ;;  %vm212_vm0 = vmmov 0   ;;  %v154_v1 = vld [vmem:[#allocation5] sm:$0xff]   ;;  %vm64_vm1 = vcmask 130048   ;;  %v120_v12 = vstv %s290_s4 }
  0x26   :  { %142 = vmatprep.subr.bf16.mxu0 %v211_v0  ;;  %144 = vmatprep.mubr.msk.bf16.mxu0 %vm212_vm0, %v211_v0  ;;  %v48_v2 = vld [vmem:[#allocation3] sm:$0xf]  ;;  %vm128_vm2 = vcmask 7168  }
  0x27   :  { %143 = vmatpush3.bf16.msra.mxu0 %v154_v1  ;;  %v136_v3 = vld [vmem:[%s288_s2] ss:$0 sm:$0xff] }
  0x28   :  { %v139_v8 = vld [vmem:[%s289_s3] ss:$0 sm:$0xff] }
  0x2a   :  { %145 = vmatmul.mubr.msk.bf16.vlgmr.msra.gmra.mrb[0].mxu0 %vm64_vm1, %v48_v2 }
  0xfd   :  { %v102_v4 = vpop.f32.mrb[0].mxu0 }
  0xfe   :  { %v103_v5 = vadd.f32 %v136_v3, %v102_v4  ;;  %v146_v6 = vpop.f32.mrb[1].mxu0 }
  0xff   :  { %v105_v7 = vpop.f32.mrb[2].mxu0 }
 0x100   :  { %v108_v9 = vmax.f32 %v103_v5, 0.0  ;;  %v147_v10 = vpop.f32.mrb[3].mxu0 }
 0x102   :  { %v116_v11 = vmul.f32 %v139_v8, %v108_v9 }
 0x104   :  { %117 = vadd.xlane.f32.xlu0 %v116_v11 }
 0x191   :  { %v118_v13 = vpop.xlane.xlu0 %117 }
 0x192   :  { %v121_v14 = vadd.f32 %v120_v12, %v118_v13 }
 0x194   :  { %v122_v15 = vsub.f32 0.0, %v121_v14 }
 0x196   :  { %v123_v16 = vmul.f32 1.442695, %v122_v15 }
 0x198   :  { %155 = vpow2.f32 %v123_v16 }
 0x1a2   :  { %v156_v17 = vpop.eup %155 }
 0x1a3   :  { %v125_v18 = vadd.f32 1.0, %v156_v17 }
 0x1a5   :  { %157 = vrcp.f32 %v125_v18 }
 0x1af   :  { %v158_v19 = vpop.eup %157 }
 0x1b0   :  { %129 = vst.msk [vmem:[%s291_s5] sm:$0xff] %vm128_vm2, %v158_v19 }
 0x1b1   :  { %134 = vsyncpa [#allocation4], 1 }
 0x1b2   :  { %135 = vsyncpa [#allocation6], 1 }

</bundles_post_ra>
